<compile_context>
chip_gen: v7x
topology: tpu7x:2x2x1
jax: 0.10.0
libtpu: 0.0.40
codegen_flags: <defaults>
</compile_context>

<pallas_src>
import jax
import jax.numpy as jnp
from jax import lax
from jax.experimental import pallas as pl
from jax.experimental.pallas import tpu as pltpu


def _make_kernel(dout):
    def kernel(x_ref, w_ref, b_ref, out_ref):
        # One fused matmul on the MXU, f32 accumulation.
        y = jnp.dot(x_ref[...], w_ref[...], preferred_element_type=jnp.float32)
        y = y + b_ref[...]
        # Columns [0:dout] -> mu (identity), [dout:2*dout] -> sigmoid branch.
        col = lax.broadcasted_iota(jnp.int32, y.shape, 1)
        y = jnp.where(col < dout, y, jax.nn.sigmoid(y))
        out_ref[...] = y.astype(out_ref.dtype)
    return kernel


def _choose_block_rows(B, Din, Dout, itemsize, budget_bytes=8 << 20):
    """Pick a batch tile that keeps double-buffered tiles well inside scoped
    VMEM on every TPU generation (v7x has the smallest VMEM)."""
    per_row = 2 * (Din + 2 * Dout) * itemsize  # dbl-buffered x tile + out tile
    bt = max(8, budget_bytes // max(per_row, 1))
    bt = (bt // 8) * 8                         # sublane-aligned
    if bt >= B:
        return B                               # single full-array block
    return min(bt, 1024)                       # 512-1024 hits ~85% HBM roofline


def gaussian_layer_1d(x, w_mu, b_mu, w_var, b_var, *, block_rows=None):
    """x: (B, Din); w_*: (Din, Dout) already transposed; b_*: (Dout,)."""
    B, Din = x.shape
    Dout = w_mu.shape[1]
    itemsize = jnp.dtype(x.dtype).itemsize

    # Fuse the two Linear branches: one weight / one bias.
    w_cat = jnp.concatenate([w_mu, w_var], axis=1)                   # (Din, 2*Dout)
    b_cat = jnp.concatenate([b_mu, b_var], axis=0).reshape(1, 2 * Dout)

    if block_rows is None:
        block_rows = _choose_block_rows(B, Din, Dout, itemsize)
    grid = (pl.cdiv(B, block_rows),)

    cost = pl.CostEstimate(
        flops=2 * B * Din * (2 * Dout),
        transcendentals=B * Dout,
        bytes_accessed=(x.size + w_cat.size + b_cat.size + B * 2 * Dout) * itemsize,
    )

    out = pl.pallas_call(
        _make_kernel(Dout),
        out_shape=jax.ShapeDtypeStruct((B, 2 * Dout), x.dtype),
        grid=grid,
        in_specs=[
            # x: tiled along batch.
            pl.BlockSpec((block_rows, Din), lambda i: (i, 0)),
            # Weights / bias: constant block index -> VMEM-resident, no re-DMA.
            pl.BlockSpec((Din, 2 * Dout), lambda i: (0, 0)),
            pl.BlockSpec((1, 2 * Dout), lambda i: (0, 0)),
        ],
        out_specs=pl.BlockSpec((block_rows, 2 * Dout), lambda i: (i, 0)),
        compiler_params=pltpu.CompilerParams(
            dimension_semantics=("parallel",),
        ),
        cost_estimate=cost,
    )(x, w_cat, b_cat)

    # Split the lane-dense combined output outside the kernel.
    mu = out[:, :Dout]
    logvar = out[:, Dout:]
    return mu, logvar


def _ref(x, w_mu, b_mu, w_var, b_var):
    mu = x @ w_mu + b_mu
    logvar = jax.nn.sigmoid(x @ w_var + b_var)
    return mu, logvar


if __name__ == "__main__":
    key = jax.random.PRNGKey(0)
    k_x, k_wm, k_bm, k_wv, k_bv = jax.random.split(key, 5)

    batch = 8
    input_dim = 32
    output_dim = 16

    x = jax.random.normal(k_x, (batch, input_dim), dtype=jnp.float32)

    # nn.Linear-style init (W (Dout, Din), b (Dout,)), stored pre-transposed
    # as (Din, Dout) for the kernel's x @ W layout.
    bound = 1.0 / jnp.sqrt(input_dim)
    w_mu = jax.random.uniform(k_wm, (input_dim, output_dim),
                              minval=-bound, maxval=bound, dtype=jnp.float32)
    b_mu = jax.random.uniform(k_bm, (output_dim,),
                              minval=-bound, maxval=bound, dtype=jnp.float32)
    w_var = jax.random.uniform(k_wv, (input_dim, output_dim),
                               minval=-bound, maxval=bound, dtype=jnp.float32)
    b_var = jax.random.uniform(k_bv, (output_dim,),
                               minval=-bound, maxval=bound, dtype=jnp.float32)

    mu, logvar = gaussian_layer_1d(x, w_mu, b_mu, w_var, b_var)
    jax.block_until_ready((mu, logvar))

    mu_ref, logvar_ref = _ref(x, w_mu, b_mu, w_var, b_var)
    assert jnp.allclose(mu, mu_ref, atol=1e-5), "mu mismatch"
    assert jnp.allclose(logvar, logvar_ref, atol=1e-5), "logvar mismatch"

    # TODO(synk): at this demo shape (8x32->16) the call is pure launch/DMA
    # overhead; in a real model this layer should be fused into its caller or
    # many heads should be stacked so M/N reach MXU granularity.
    print("KERNEL_OK")
</pallas_src>

<mosaic_0001>
module attributes {stable_mosaic.version = 11 : i64} {
  func.func @kernel(%arg0: i32, %arg1: memref<8x32xf32, #tpu.memory_space<vmem>>, %arg2: memref<32x32xf32, #tpu.memory_space<vmem>>, %arg3: memref<1x32xf32, #tpu.memory_space<vmem>>, %arg4: memref<8x32xf32, #tpu.memory_space<vmem>>) attributes {dimension_semantics = [#tpu.dimension_semantics<parallel>], iteration_bounds = array<i64: 1>, scalar_prefetch = 0 : i64, scratch_operands = 0 : i64, tpu.core_type = #tpu.core_type<tc>, window_params = [{transform_indices = @transform_0, window_bounds = array<i64: 8, 32>}, {pipeline_mode = #tpu.pipeline_mode<synchronous>, transform_indices = @transform_1, window_bounds = array<i64: 32, 32>}, {pipeline_mode = #tpu.pipeline_mode<synchronous>, transform_indices = @transform_2, window_bounds = array<i64: 1, 32>}, {transform_indices = @transform_3, window_bounds = array<i64: 8, 32>}]} {
    %c0 = arith.constant 0 : index
    %c0_0 = arith.constant 0 : index
    %0 = vector.load %arg1[%c0, %c0_0] : memref<8x32xf32, #tpu.memory_space<vmem>>, vector<8x32xf32>
    %c0_1 = arith.constant 0 : index
    %c0_2 = arith.constant 0 : index
    %1 = vector.load %arg2[%c0_1, %c0_2] : memref<32x32xf32, #tpu.memory_space<vmem>>, vector<32x32xf32>
    %cst = arith.constant dense<0.000000e+00> : vector<8x32xf32>
    %2 = tpu.matmul %0, %1, %cst {dimension_numbers = #tpu.dot_dimension_numbers<[1], [0], [0], [1], [0, 0, 1, 1], [], []>} : vector<8x32xf32>, vector<32x32xf32>, vector<8x32xf32> -> vector<8x32xf32>
    %c0_3 = arith.constant 0 : index
    %c0_4 = arith.constant 0 : index
    %3 = vector.load %arg3[%c0_3, %c0_4] : memref<1x32xf32, #tpu.memory_space<vmem>>, vector<1x32xf32>
    %4 = vector.broadcast %3 : vector<1x32xf32> to vector<8x32xf32>
    %5 = arith.addf %2, %4 : vector<8x32xf32>
    %6 = tpu.iota {dimensions = array<i32: 1>} : vector<8x32xi32>
    %c16_i32 = arith.constant 16 : i32
    %7 = vector.broadcast %c16_i32 : i32 to vector<8x32xi32>
    %8 = arith.cmpi slt, %6, %7 : vector<8x32xi32>
    %9 = arith.negf %5 : vector<8x32xf32>
    %10 = math.exp %9 : vector<8x32xf32>
    %cst_5 = arith.constant 1.000000e+00 : f32
    %11 = vector.broadcast %cst_5 : f32 to vector<8x32xf32>
    %12 = arith.addf %11, %10 : vector<8x32xf32>
    %13 = arith.divf %11, %12 : vector<8x32xf32>
    %14 = arith.select %8, %5, %13 : vector<8x32xi1>, vector<8x32xf32>
    %c0_6 = arith.constant 0 : index
    %c0_7 = arith.constant 0 : index
    %15 = vector.load %arg4[%c0_6, %c0_7] : memref<8x32xf32, #tpu.memory_space<vmem>>, vector<8x32xf32>
    tpu.vector_store %arg4[%c0_6, %c0_7], %14 {strides = array<i32>} : memref<8x32xf32, #tpu.memory_space<vmem>>, vector<8x32xf32>,
    return
  }
  func.func @transform_0(%arg0: i32) -> (i32, i32) {
    %c0_i32 = arith.constant 0 : i32
    %c0_i32_0 = arith.constant 0 : i32
    return %arg0, %c0_i32 : i32, i32
  }
  func.func @transform_1(%arg0: i32) -> (i32, i32) {
    %c0_i32 = arith.constant 0 : i32
    %c0_i32_0 = arith.constant 0 : i32
    %c0_i32_1 = arith.constant 0 : i32
    return %c0_i32, %c0_i32_0 : i32, i32
  }
  func.func @transform_2(%arg0: i32) -> (i32, i32) {
    %c0_i32 = arith.constant 0 : i32
    %c0_i32_0 = arith.constant 0 : i32
    %c0_i32_1 = arith.constant 0 : i32
    return %c0_i32, %c0_i32_0 : i32, i32
  }
  func.func @transform_3(%arg0: i32) -> (i32, i32) {
    %c0_i32 = arith.constant 0 : i32
    %c0_i32_0 = arith.constant 0 : i32
    return %arg0, %c0_i32 : i32, i32
  }
}

</mosaic_0001>

<bundles_post_ra>
// kernel: tpu_custom_call.1
= control target key start
LH: loop header
LB: loop body
LE: loop exit
PB: predicated region body
PF: predicated region fallthrough
CT: control target
= control target key end

     0   :  { %8 = vsyncpa [#allocation3], 0  ;;  %s339_s0 = inlined_call_operand.hbm [shape: f32[8,32], index: 0, kind: input, shape index: {}]   ;;  %s340_s1 = inlined_call_operand.hbm [shape: f32[32,32], index: 1, kind: input, shape index: {}]   ;;  %s341_s2 = inlined_call_operand.vmem [shape: f32[1,32], index: 2, kind: input, shape index: {}]   ;;  %s342_s3 = inlined_call_operand.hbm [shape: f32[8,32], index: 3, kind: output, shape index: {}]  }
   0x1   :  { %9 = vsyncpa [#allocation6], 0 }
   0x2   :  { %10 = vsyncpa [#allocation4], 0  ;;  %s263_s12 = smov [#allocation2]   ;;  %s264_s14 = smov [#allocation5]  }
   0x3   :  { %s17_s13 = sshll.u32 %s263_s12, 4  ;;  %s26_s15 = sshll.u32 %s264_s14, 4  ;;  %s18_s13 = int_to_ptr.vmem [resolvable:$true] %s17_s13  ;;  %s291_s15 = int_to_ptr.vmem [resolvable:$true] %s26_s15 }
   0x4   :  { %s191_s18 = scalar_lea.hbm %s339_s0, 128 }
   0x5   :  { %p192_p0 = scmp.ne.s32.totalorder %s339_s0, %s191_s18  ;;  %p195_p1 = scmp.lt.u32.totalorder %s191_s18, %s339_s0 }
   0x7   :  { %p197_p2 = pnand %p195_p1, %p192_p0 }
   0x9   :  { %200 = shalt.err (!%p197_p2)
}
   0xa   :  { %s201_s23 = scalar_lea.vmem %s18_s13, 128  ;;  %p206_p4 = scmp.lt.s32.totalorder %s18_s13, %s18_s13 }
   0xb   :  { %p202_p3 = scmp.ne.s32.totalorder %s18_s13, %s201_s23  ;;  %p207_p5 = scmp.lt.s32.totalorder %s201_s23, %s201_s23 }
   0xd   :  { %p208_p6 = por %p207_p5, %p206_p4 }
   0xf   :  { %p209_p7 = pnand %p208_p6, %p202_p3 }
  0x11   :  { %212 = shalt.err (!%p209_p7)
}
  0x12   :  { %20 = dma.hbm_to_vmem [thread:$0]  %s339_s0, 128, %s18_s13, [#allocation3]  }
  0x13   :  { %s213_s28 = scalar_lea.hbm %s340_s1, 512 }
  0x14   :  { %p214_p8 = scmp.ne.s32.totalorder %s340_s1, %s213_s28  ;;  %p217_p9 = scmp.lt.u32.totalorder %s213_s28, %s340_s1 }
  0x16   :  { %p219_p10 = pnand %p217_p9, %p214_p8 }
  0x18   :  { %222 = shalt.err (!%p219_p10)
}
  0x19   :  { %s223_s6 = scalar_lea.vmem %s291_s15, 512  ;;  %p228_p12 = scmp.lt.s32.totalorder %s291_s15, %s291_s15 }
  0x1a   :  { %p224_p11 = scmp.ne.s32.totalorder %s291_s15, %s223_s6  ;;  %p229_p13 = scmp.lt.s32.totalorder %s223_s6, %s223_s6 }
  0x1c   :  { %p230_p0 = por %p229_p13, %p228_p12 }
  0x1e   :  { %p231_p1 = pnand %p230_p0, %p224_p11 }
  0x20   :  { %234 = shalt.err (!%p231_p1)
}
  0x21   :  { %s265_s0 = smov 128   ;;  %s266_s7 = smov 8  }
  0x22   :  { %32 = dma.hbm_to_vmem [thread:$0]  %s340_s1, 512, %s291_s15, [#allocation6], %s265_s0, %s265_s0, %s266_s7  }
  0x23   :  { %257 = dma.done.wait [#allocation3], 128  }
  0x24   :  { %258 = vsyncadd [#allocation3], 4294967168 }
  0x25   :  { %259 = dma.done.wait [#allocation6], 512  }
  0x26   :  { %260 = vsyncadd [#allocation6], 4294966784  ;;  %v267_v0 = vmov 0.0|0.0   ;;  %vm268_vm0 = vmmov 0   ;;  %v269_v1 = vmov 0.0   ;;  %v42_v2 = vld [vmem:[#allocation5] sm:$0xff]  ;;  %v127_v16 = vlaneseq }
  0x27   :  { %173 = vmatprep.subr.bf16.mxu0 %v267_v0  ;;  %170 = vmatprep.mubr.msk.f32.mxu0 %vm268_vm0, %v269_v1  ;;  %v43_v3 = vld [vmem:[#allocation5 + $0x8] sm:$0xff]  ;;  %v44_v4 = vld [vmem:[#allocation5 + $0x10] sm:$0xff]  ;;  %v45_v6 = vld [vmem:[#allocation5 + $0x18] sm:$0xff]  ;;  %vm53_vm1 = vcmask 261120   ;;  %s270_s11 = smov [#allocation7]  }
  0x28   :  { %v174_v5 = vpack.c.bf16 %v43_v3, %v42_v2  ;;  %v177_v7 = vpack.c.bf16 %v45_v6, %v44_v4  ;;  %v41_v8 = vld [vmem:[#allocation2] sm:$0xff]  ;;  %v128_v17 = vand.u32 127, %v127_v16  ;;  %s144_s12 = sshll.u32 %s270_s11, 4  ;;  %s145_s12 = int_to_ptr.vmem [resolvable:$true] %s144_s12 }
  0x29   :  { %v154_v9 = vld [vmem:[%s341_s2] ss:$0 sm:$0xff]  ;;  %s235_s13 = scalar_lea.vmem %s145_s12, 128  ;;  %p240_p3 = scmp.lt.s32.totalorder %s145_s12, %s145_s12 }
  0x2a   :  { %175 = vmatpush3.bf16.msra.mxu0 %v174_v5  ;;  %vm129_vm2 = vcmp.lt.s32.totalorder %v128_v17, 16  ;;  %p236_p2 = scmp.ne.s32.totalorder %s145_s12, %s235_s13  ;;  %p241_p4 = scmp.lt.s32.totalorder %s235_s13, %s235_s13 }
  0x2b   :  { %176 = vmatprep.subr.bf16.mxu0 %v267_v0 }
  0x2c   :  { %p242_p5 = por %p241_p4, %p240_p3 }
  0x2e   :  { %178 = vmatpush3.bf16.msra.mxu0 %v177_v7  ;;  %p243_p6 = pnand %p242_p5, %p236_p2 }
  0x31   :  { %171 = vmatmul.mubr.msk.f32.vlgmr.msra.gmra.mrb[0].mxu0 %vm53_vm1, %v41_v8 }
 0x104   :  { %v123_v10 = vpop.f32.mrb[0].mxu0 }
 0x105   :  { %v124_v11 = vadd.f32 %v154_v9, %v123_v10  ;;  %v172_v12 = vpop.f32.mrb[1].mxu0 }
 0x107   :  { %v156_v13 = vmul.f32 -1.442695, %v124_v11 }
 0x109   :  { %187 = vpow2.f32 %v156_v13 }
 0x113   :  { %v188_v14 = vpop.eup %187 }
 0x114   :  { %v133_v15 = vadd.f32 1.0, %v188_v14 }
 0x116   :  { %189 = vrcp.f32 %v133_v15 }
 0x120   :  { %v190_v18 = vpop.eup %189 }
 0x121   :  { %v136_v19 = vsel %vm129_vm2, %v124_v11, %v190_v18 }
 0x122   :  { %137 = vst.msk [vmem:[#allocation7] sm:$0xff] %vm53_vm1, %v136_v19 }
 0x123   :  { %246 = shalt.err (!%p243_p6)
}
 0x124   :  { %s247_s15 = scalar_lea.hbm %s342_s3, 128 }
 0x125   :  { %p248_p7 = scmp.ne.s32.totalorder %s342_s3, %s247_s15  ;;  %p251_p8 = scmp.lt.u32.totalorder %s247_s15, %s342_s3 }
 0x127   :  { %p253_p9 = pnand %p251_p8, %p248_p7 }
 0x129   :  { %256 = shalt.err (!%p253_p9)
}
 0x12a   :  { %147 = dma.vmem_to_hbm [thread:$0]  %s145_s12, 128, %s342_s3, [#allocation4]  }
 0x12b   :  { %261 = dma.done.wait [#allocation4], 128  }
 0x12c   :  { %262 = vsyncadd [#allocation4], 4294967168 }
 0x12d   :  { %151 = vsyncpa [#allocation3], 1 }
 0x12e   :  { %152 = vsyncpa [#allocation6], 1 }
 0x12f   :  { %153 = vsyncpa [#allocation4], 1 }

</bundles_post_ra>
